<compile_context>
chip_gen: v7x
topology: tpu7x:2x2x1
jax: 0.10.0
libtpu: 0.0.40
codegen_flags: <defaults>
</compile_context>

<pallas_src>
import jax
import jax.numpy as jnp
import numpy as np
from jax.experimental import pallas as pl
from jax.experimental.pallas import tpu as pltpu

EPS = 1e-5


def make_residual_kernel(W, HW, b_blk, has_skip):
    L = b_blk * HW

    def kernel(x_ref, masks_ref, ssum_ref, sbc_ref, w1_ref, w2_ref, w3_ref,
               *rest):
        if has_skip:
            ws_ref, bs_ref, o_ref = rest
        else:
            (o_ref,) = rest

        xb = x_ref[...].astype(jnp.float32)            # (Cin, L)
        masks = masks_ref[...]                         # (9, L) boundary masks
        ssum = ssum_ref[...]                           # (L, b_blk)  1/HW block-diag
        sbc = sbc_ref[...] if b_blk > 1 else None      # (b_blk, L)  0/1 block-diag
        w1 = w1_ref[...]                               # (Chp, Cin)
        w2 = w2_ref[...]                               # (Chp, 9*Chp)
        w3 = w3_ref[...]                               # (Cout, Chp)

        def inorm_relu(y):
            # Affine-free InstanceNorm2d + ReLU, per instance (per HW segment
            # of the lane axis).  Reductions & broadcasts run on the MXU.
            m = jnp.dot(y, ssum, preferred_element_type=jnp.float32)       # E[y]
            q = jnp.dot(y * y, ssum, preferred_element_type=jnp.float32)   # E[y^2]
            scale = jax.lax.rsqrt(q - m * m + EPS)                         # (C, b_blk)
            shift = -m * scale
            if b_blk > 1:
                scale = jnp.dot(scale, sbc, preferred_element_type=jnp.float32)
                shift = jnp.dot(shift, sbc, preferred_element_type=jnp.float32)
            # b_blk == 1: (C, 1) broadcasts over the lane axis directly.
            return jnp.maximum(y * scale + shift, 0.0)

        # --- ConvBnRelu 1: 1x1 conv + IN + ReLU.  Conv bias omitted: a
        # per-channel constant is exactly cancelled by the affine-free IN.
        y1 = inorm_relu(jnp.dot(w1, xb, preferred_element_type=jnp.float32))

        # --- ConvBnRelu 2: 3x3 stride-1 pad-1 conv fused into ONE matmul.
        # Nine lane-rolled, boundary-masked views of y1 stacked into a
        # sublane-aligned (9*Chp, L) patch matrix, contracted once on the MXU.
        taps = []
        for dy in (-1, 0, 1):
            for dx in (-1, 0, 1):
                t_idx = (dy + 1) * 3 + (dx + 1)
                shift = (-(dy * W + dx)) % L
                t = pltpu.roll(y1, shift=shift, axis=1) if shift else y1
                if dy != 0 or dx != 0:
                    t = t * masks[t_idx:t_idx + 1, :]
                taps.append(t)
        patches = jnp.concatenate(taps, axis=0)        # (9*Chp, L), 8-aligned
        y2 = inorm_relu(jnp.dot(w2, patches, preferred_element_type=jnp.float32))

        # --- ConvBnRelu 3: 1x1 conv + IN + ReLU.
        y3 = inorm_relu(jnp.dot(w3, y2, preferred_element_type=jnp.float32))

        # --- Skip layer (identity when in_channels == out_channels).
        if has_skip:
            z = jnp.dot(ws_ref[...], xb,
                        preferred_element_type=jnp.float32) + bs_ref[...]
        else:
            z = xb

        o_ref[...] = (y3 + z).astype(o_ref.dtype)

    return kernel


def _pick_batch_block(N, HW, Chp):
    """Instances per grid step: as many as a ~16 MiB intermediate budget
    allows; keep >= 2 balanced steps when the whole batch fits (v7x megacore),
    and keep the block lane width 128-divisible."""
    per_lane = 4 * (2 * 9 * Chp + 6 * Chp + 32)     # f32 bytes/lane of big temps
    b_max = max(1, ((16 << 20) // per_lane) // HW)
    if N <= b_max:
        if N >= 2 and N % 2 == 0 and ((N // 2) * HW) % 128 == 0:
            return N // 2                            # two balanced steps
        return N                                     # single whole-batch step
    for d in range(min(b_max, N - 1), 0, -1):
        if N % d == 0 and (d * HW) % 128 == 0:
            return d
    return N                                         # fallback: whole batch


def residual_forward(x_nchw, params):
    """x_nchw: (N, Cin, H, W) float32.  Returns (N, Cout, H, W)."""
    w1, b1, w2, b2, w3, b3, ws, bs = params
    del b1, b2, b3                 # pre-InstanceNorm conv biases cancel exactly
    N, Cin, H, W = x_nchw.shape
    Ch = w1.shape[0]
    Cout = w3.shape[0]
    HW = H * W
    has_skip = ws is not None
    Chp = ((Ch + 7) // 8) * 8      # hidden channels padded to a sublane multiple

    b_blk = _pick_batch_block(N, HW, Chp)
    L = b_blk * HW
    grid = N // b_blk

    # Channel-major layout (one cheap XLA relayout each way): instances tile
    # the lane axis so every layer is a single wide matmul per grid step.
    x_cm = x_nchw.reshape(N, Cin, HW).transpose(1, 0, 2).reshape(Cin, N * HW)

    # --- host-side constants ------------------------------------------------
    # Zero-pad hidden channels to Chp so the 9-tap concat is sublane-aligned;
    # padded rows stay exactly zero through IN + ReLU.
    w1p = jnp.zeros((Chp, Cin), jnp.float32).at[:Ch, :].set(w1)
    w2t = jnp.transpose(w2, (3, 0, 1, 2)).reshape(Ch, 9, Ch)     # [o, t, i]
    w2p = (jnp.zeros((Chp, 9, Chp), jnp.float32)
           .at[:Ch, :, :Ch].set(w2t).reshape(Chp, 9 * Chp))
    w3p = jnp.zeros((Cout, Chp), jnp.float32).at[:, :Ch].set(w3)

    # Boundary masks for the nine 3x3 taps, tiled per instance so lane rolls
    # that wrap across instance boundaries are zeroed.
    hh, ww = np.meshgrid(np.arange(H), np.arange(W), indexing="ij")
    masks_np = np.zeros((9, HW), np.float32)
    for dy in (-1, 0, 1):
        for dx in (-1, 0, 1):
            valid = ((hh + dy >= 0) & (hh + dy < H) &
                     (ww + dx >= 0) & (ww + dx < W))
            masks_np[(dy + 1) * 3 + (dx + 1)] = valid.reshape(-1)
    masks = jnp.asarray(np.tile(masks_np, (1, b_blk)))           # (9, L)

    # Block-diagonal ones matrices: per-instance mean / E[y^2] reduction and
    # broadcast-back as MXU matmuls (ssum carries the 1/HW scaling).
    inst = np.repeat(np.arange(b_blk), HW)
    onehot = (inst[:, None] == np.arange(b_blk)[None, :]).astype(np.float32)
    ssum = jnp.asarray(onehot / np.float32(HW))                  # (L, b_blk)
    sbc = jnp.asarray(onehot.T)                                  # (b_blk, L)

    def full_spec(shape):
        nd = len(shape)
        return pl.BlockSpec(shape, lambda n, _nd=nd: (0,) * _nd)

    in_specs = [
        pl.BlockSpec((Cin, L), lambda n: (0, n)),
        full_spec(masks.shape),
        full_spec(ssum.shape),
        full_spec(sbc.shape),
        full_spec(w1p.shape),
        full_spec(w2p.shape),
        full_spec(w3p.shape),
    ]
    args = [x_cm, masks, ssum, sbc, w1p, w2p, w3p]
    if has_skip:
        bs2 = jnp.asarray(bs).reshape(Cout, 1)
        in_specs += [full_spec(ws.shape), full_spec(bs2.shape)]
        args += [jnp.asarray(ws), bs2]

    kernel = make_residual_kernel(W, HW, b_blk, has_skip)

    out_cm = pl.pallas_call(
        kernel,
        out_shape=jax.ShapeDtypeStruct((Cout, N * HW), x_nchw.dtype),
        grid=(grid,),
        in_specs=in_specs,
        out_specs=pl.BlockSpec((Cout, L), lambda n: (0, n)),
        compiler_params=pltpu.CompilerParams(
            dimension_semantics=("parallel",),
            vmem_limit_bytes=64 * 1024 * 1024),
    )(*args)

    return (out_cm.reshape(Cout, N, HW).transpose(1, 0, 2)
            .reshape(N, Cout, H, W))


def residual_reference(x_nchw, params):
    """Pure-JAX NCHW reference matching the PyTorch forward (validation)."""
    w1, b1, w2, b2, w3, b3, ws, bs = params

    def inorm_relu(y):
        mean = y.mean(axis=(2, 3), keepdims=True)
        var = ((y - mean) ** 2).mean(axis=(2, 3), keepdims=True)
        return jnp.maximum((y - mean) / jnp.sqrt(var + EPS), 0.0)

    y = inorm_relu(jnp.einsum("oc,nchw->nohw", w1, x_nchw)
                   + b1[None, :, None, None])
    y = jax.lax.conv_general_dilated(
        y, w2, window_strides=(1, 1), padding="SAME",
        dimension_numbers=("NCHW", "HWIO", "NCHW")) + b2[None, :, None, None]
    y = inorm_relu(y)
    y = inorm_relu(jnp.einsum("oc,nchw->nohw", w3, y)
                   + b3[None, :, None, None])
    if ws is not None:
        z = jnp.einsum("oc,nchw->nohw", ws, x_nchw) + bs[None, :, None, None]
    else:
        z = x_nchw
    return y + z


if __name__ == "__main__":
    key = jax.random.PRNGKey(0)
    N, Cin, H, W = 2, 4, 16, 16
    Cout = 8
    Ch = Cout // 2                                # out_channels // 2

    ks = jax.random.split(key, 9)
    x = jax.random.normal(ks[0], (N, Cin, H, W), jnp.float32)

    # Synthetic parameters; shapes follow the PyTorch __init__ (1x1 conv
    # weights stored as (out, in); 3x3 conv weight stored HWIO).
    w1 = 0.3 * jax.random.normal(ks[1], (Ch, Cin), jnp.float32)
    b1 = 0.1 * jax.random.normal(ks[2], (Ch,), jnp.float32)
    w2 = 0.3 * jax.random.normal(ks[3], (3, 3, Ch, Ch), jnp.float32)
    b2 = 0.1 * jax.random.normal(ks[4], (Ch,), jnp.float32)
    w3 = 0.3 * jax.random.normal(ks[5], (Cout, Ch), jnp.float32)
    b3 = 0.1 * jax.random.normal(ks[6], (Cout,), jnp.float32)
    ws = 0.3 * jax.random.normal(ks[7], (Cout, Cin), jnp.float32)
    bs = 0.1 * jax.random.normal(ks[8], (Cout,), jnp.float32)

    # Case 1: in_channels != out_channels (skip is a 1x1 conv).
    params = (w1, b1, w2, b2, w3, b3, ws, bs)
    out = jax.block_until_ready(residual_forward(x, params))
    ref = jax.block_until_ready(residual_reference(x, params))
    np.testing.assert_allclose(np.asarray(out), np.asarray(ref),
                               rtol=2e-3, atol=2e-3)

    # Case 2: in_channels == out_channels (skip is identity).
    x2 = jax.random.normal(ks[0], (N, Cout, H, W), jnp.float32)
    w1i = 0.3 * jax.random.normal(ks[1], (Ch, Cout), jnp.float32)
    params_id = (w1i, b1, w2, b2, w3, b3, None, None)
    out2 = jax.block_until_ready(residual_forward(x2, params_id))
    ref2 = jax.block_until_ready(residual_reference(x2, params_id))
    np.testing.assert_allclose(np.asarray(out2), np.asarray(ref2),
                               rtol=2e-3, atol=2e-3)

    print("KERNEL_OK")
</pallas_src>

<mosaic_0001>
module attributes {stable_mosaic.version = 11 : i64} {
  func.func @kernel(%arg0: i32, %arg1: memref<4x256xf32, #tpu.memory_space<vmem>>, %arg2: memref<9x256xf32, #tpu.memory_space<vmem>>, %arg3: memref<256x1xf32, #tpu.memory_space<vmem>>, %arg4: memref<1x256xf32, #tpu.memory_space<vmem>>, %arg5: memref<8x4xf32, #tpu.memory_space<vmem>>, %arg6: memref<8x72xf32, #tpu.memory_space<vmem>>, %arg7: memref<8x8xf32, #tpu.memory_space<vmem>>, %arg8: memref<8x4xf32, #tpu.memory_space<vmem>>, %arg9: memref<8x1xf32, #tpu.memory_space<vmem>>, %arg10: memref<8x256xf32, #tpu.memory_space<vmem>>) attributes {dimension_semantics = [#tpu.dimension_semantics<parallel>], iteration_bounds = array<i64: 2>, scalar_prefetch = 0 : i64, scratch_operands = 0 : i64, tpu.core_type = #tpu.core_type<tc>, window_params = [{transform_indices = @transform_0, window_bounds = array<i64: 4, 256>}, {pipeline_mode = #tpu.pipeline_mode<synchronous>, transform_indices = @transform_1, window_bounds = array<i64: 9, 256>}, {pipeline_mode = #tpu.pipeline_mode<synchronous>, transform_indices = @transform_2, window_bounds = array<i64: 256, 1>}, {pipeline_mode = #tpu.pipeline_mode<synchronous>, transform_indices = @transform_3, window_bounds = array<i64: 1, 256>}, {pipeline_mode = #tpu.pipeline_mode<synchronous>, transform_indices = @transform_4, window_bounds = array<i64: 8, 4>}, {pipeline_mode = #tpu.pipeline_mode<synchronous>, transform_indices = @transform_5, window_bounds = array<i64: 8, 72>}, {pipeline_mode = #tpu.pipeline_mode<synchronous>, transform_indices = @transform_6, window_bounds = array<i64: 8, 8>}, {pipeline_mode = #tpu.pipeline_mode<synchronous>, transform_indices = @transform_7, window_bounds = array<i64: 8, 4>}, {pipeline_mode = #tpu.pipeline_mode<synchronous>, transform_indices = @transform_8, window_bounds = array<i64: 8, 1>}, {transform_indices = @transform_9, window_bounds = array<i64: 8, 256>}]} {
    %c0 = arith.constant 0 : index
    %c0_0 = arith.constant 0 : index
    %0 = vector.load %arg1[%c0, %c0_0] : memref<4x256xf32, #tpu.memory_space<vmem>>, vector<4x256xf32>
    %c0_1 = arith.constant 0 : index
    %c0_2 = arith.constant 0 : index
    %1 = vector.load %arg2[%c0_1, %c0_2] : memref<9x256xf32, #tpu.memory_space<vmem>>, vector<9x256xf32>
    %c0_3 = arith.constant 0 : index
    %c0_4 = arith.constant 0 : index
    %2 = vector.load %arg3[%c0_3, %c0_4] : memref<256x1xf32, #tpu.memory_space<vmem>>, vector<256x1xf32>
    %c0_5 = arith.constant 0 : index
    %c0_6 = arith.constant 0 : index
    %3 = vector.load %arg5[%c0_5, %c0_6] : memref<8x4xf32, #tpu.memory_space<vmem>>, vector<8x4xf32>
    %c0_7 = arith.constant 0 : index
    %c0_8 = arith.constant 0 : index
    %4 = vector.load %arg6[%c0_7, %c0_8] : memref<8x72xf32, #tpu.memory_space<vmem>>, vector<8x72xf32>
    %c0_9 = arith.constant 0 : index
    %c0_10 = arith.constant 0 : index
    %5 = vector.load %arg7[%c0_9, %c0_10] : memref<8x8xf32, #tpu.memory_space<vmem>>, vector<8x8xf32>
    %cst = arith.constant dense<0.000000e+00> : vector<8x256xf32>
    %6 = tpu.matmul %3, %0, %cst {dimension_numbers = #tpu.dot_dimension_numbers<[1], [0], [0], [1], [0, 0, 1, 1], [], []>} : vector<8x4xf32>, vector<4x256xf32>, vector<8x256xf32> -> vector<8x256xf32>
    %cst_11 = arith.constant dense<0.000000e+00> : vector<8x1xf32>
    %7 = tpu.matmul %6, %2, %cst_11 {dimension_numbers = #tpu.dot_dimension_numbers<[1], [0], [0], [1], [0, 0, 1, 1], [], []>} : vector<8x256xf32>, vector<256x1xf32>, vector<8x1xf32> -> vector<8x1xf32>
    %8 = arith.mulf %6, %6 : vector<8x256xf32>
    %cst_12 = arith.constant dense<0.000000e+00> : vector<8x1xf32>
    %9 = tpu.matmul %8, %2, %cst_12 {dimension_numbers = #tpu.dot_dimension_numbers<[1], [0], [0], [1], [0, 0, 1, 1], [], []>} : vector<8x256xf32>, vector<256x1xf32>, vector<8x1xf32> -> vector<8x1xf32>
    %10 = arith.mulf %7, %7 : vector<8x1xf32>
    %11 = arith.subf %9, %10 : vector<8x1xf32>
    %cst_13 = arith.constant 9.99999974E-6 : f32
    %12 = vector.broadcast %cst_13 : f32 to vector<8x1xf32>
    %13 = arith.addf %11, %12 : vector<8x1xf32>
    %14 = math.rsqrt %13 : vector<8x1xf32>
    %cst_14 = arith.constant 0.000000e+00 : f32
    %15 = vector.broadcast %cst_14 : f32 to vector<8x1xf32>
    %16 = arith.subf %15, %7 : vector<8x1xf32>
    %17 = arith.mulf %16, %14 : vector<8x1xf32>
    %18 = vector.broadcast %14 : vector<8x1xf32> to vector<8x256xf32>
    %19 = arith.mulf %6, %18 : vector<8x256xf32>
    %20 = vector.broadcast %17 : vector<8x1xf32> to vector<8x256xf32>
    %21 = arith.addf %19, %20 : vector<8x256xf32>
    %cst_15 = arith.constant 0.000000e+00 : f32
    %22 = vector.broadcast %cst_15 : f32 to vector<8x256xf32>
    %23 = arith.maximumf %21, %22 : vector<8x256xf32>
    %c17_i32 = arith.constant 17 : i32
    %24 = tpu.dynamic_rotate %23 by %c17_i32 dim 1 : vector<8x256xf32>, i32 -> vector<8x256xf32>
    %25 = vector.extract_strided_slice %1 {offsets = [0, 0], sizes = [1, 256], strides = [1, 1]} : vector<9x256xf32> to vector<1x256xf32>
    %26 = vector.broadcast %25 : vector<1x256xf32> to vector<8x256xf32>
    %27 = arith.mulf %24, %26 : vector<8x256xf32>
    %c16_i32 = arith.constant 16 : i32
    %28 = tpu.dynamic_rotate %23 by %c16_i32 dim 1 : vector<8x256xf32>, i32 -> vector<8x256xf32>
    %29 = vector.extract_strided_slice %1 {offsets = [1, 0], sizes = [1, 256], strides = [1, 1]} : vector<9x256xf32> to vector<1x256xf32>
    %30 = vector.broadcast %29 : vector<1x256xf32> to vector<8x256xf32>
    %31 = arith.mulf %28, %30 : vector<8x256xf32>
    %c15_i32 = arith.constant 15 : i32
    %32 = tpu.dynamic_rotate %23 by %c15_i32 dim 1 : vector<8x256xf32>, i32 -> vector<8x256xf32>
    %33 = vector.extract_strided_slice %1 {offsets = [2, 0], sizes = [1, 256], strides = [1, 1]} : vector<9x256xf32> to vector<1x256xf32>
    %34 = vector.broadcast %33 : vector<1x256xf32> to vector<8x256xf32>
    %35 = arith.mulf %32, %34 : vector<8x256xf32>
    %c1_i32 = arith.constant 1 : i32
    %36 = tpu.dynamic_rotate %23 by %c1_i32 dim 1 : vector<8x256xf32>, i32 -> vector<8x256xf32>
    %37 = vector.extract_strided_slice %1 {offsets = [3, 0], sizes = [1, 256], strides = [1, 1]} : vector<9x256xf32> to vector<1x256xf32>
    %38 = vector.broadcast %37 : vector<1x256xf32> to vector<8x256xf32>
    %39 = arith.mulf %36, %38 : vector<8x256xf32>
    %c255_i32 = arith.constant 255 : i32
    %40 = tpu.dynamic_rotate %23 by %c255_i32 dim 1 : vector<8x256xf32>, i32 -> vector<8x256xf32>
    %41 = vector.extract_strided_slice %1 {offsets = [5, 0], sizes = [1, 256], strides = [1, 1]} : vector<9x256xf32> to vector<1x256xf32>
    %42 = vector.broadcast %41 : vector<1x256xf32> to vector<8x256xf32>
    %43 = arith.mulf %40, %42 : vector<8x256xf32>
    %c241_i32 = arith.constant 241 : i32
    %44 = tpu.dynamic_rotate %23 by %c241_i32 dim 1 : vector<8x256xf32>, i32 -> vector<8x256xf32>
    %45 = vector.extract_strided_slice %1 {offsets = [6, 0], sizes = [1, 256], strides = [1, 1]} : vector<9x256xf32> to vector<1x256xf32>
    %46 = vector.broadcast %45 : vector<1x256xf32> to vector<8x256xf32>
    %47 = arith.mulf %44, %46 : vector<8x256xf32>
    %c240_i32 = arith.constant 240 : i32
    %48 = tpu.dynamic_rotate %23 by %c240_i32 dim 1 : vector<8x256xf32>, i32 -> vector<8x256xf32>
    %49 = vector.extract_strided_slice %1 {offsets = [7, 0], sizes = [1, 256], strides = [1, 1]} : vector<9x256xf32> to vector<1x256xf32>
    %50 = vector.broadcast %49 : vector<1x256xf32> to vector<8x256xf32>
    %51 = arith.mulf %48, %50 : vector<8x256xf32>
    %c239_i32 = arith.constant 239 : i32
    %52 = tpu.dynamic_rotate %23 by %c239_i32 dim 1 : vector<8x256xf32>, i32 -> vector<8x256xf32>
    %53 = vector.extract_strided_slice %1 {offsets = [8, 0], sizes = [1, 256], strides = [1, 1]} : vector<9x256xf32> to vector<1x256xf32>
    %54 = vector.broadcast %53 : vector<1x256xf32> to vector<8x256xf32>
    %55 = arith.mulf %52, %54 : vector<8x256xf32>
    %56 = tpu.concatenate %27, %31, %35, %39, %23, %43, %47, %51, %55 in 0 : vector<8x256xf32>, vector<8x256xf32>, vector<8x256xf32>, vector<8x256xf32>, vector<8x256xf32>, vector<8x256xf32>, vector<8x256xf32>, vector<8x256xf32>, vector<8x256xf32> -> vector<72x256xf32>
    %cst_16 = arith.constant dense<0.000000e+00> : vector<8x256xf32>
    %57 = tpu.matmul %4, %56, %cst_16 {dimension_numbers = #tpu.dot_dimension_numbers<[1], [0], [0], [1], [0, 0, 1, 1], [], []>} : vector<8x72xf32>, vector<72x256xf32>, vector<8x256xf32> -> vector<8x256xf32>
    %cst_17 = arith.constant dense<0.000000e+00> : vector<8x1xf32>
    %58 = tpu.matmul %57, %2, %cst_17 {dimension_numbers = #tpu.dot_dimension_numbers<[1], [0], [0], [1], [0, 0, 1, 1], [], []>} : vector<8x256xf32>, vector<256x1xf32>, vector<8x1xf32> -> vector<8x1xf32>
    %59 = arith.mulf %57, %57 : vector<8x256xf32>
    %cst_18 = arith.constant dense<0.000000e+00> : vector<8x1xf32>
    %60 = tpu.matmul %59, %2, %cst_18 {dimension_numbers = #tpu.dot_dimension_numbers<[1], [0], [0], [1], [0, 0, 1, 1], [], []>} : vector<8x256xf32>, vector<256x1xf32>, vector<8x1xf32> -> vector<8x1xf32>
    %61 = arith.mulf %58, %58 : vector<8x1xf32>
    %62 = arith.subf %60, %61 : vector<8x1xf32>
    %cst_19 = arith.constant 9.99999974E-6 : f32
    %63 = vector.broadcast %cst_19 : f32 to vector<8x1xf32>
    %64 = arith.addf %62, %63 : vector<8x1xf32>
    %65 = math.rsqrt %64 : vector<8x1xf32>
    %cst_20 = arith.constant 0.000000e+00 : f32
    %66 = vector.broadcast %cst_20 : f32 to vector<8x1xf32>
    %67 = arith.subf %66, %58 : vector<8x1xf32>
    %68 = arith.mulf %67, %65 : vector<8x1xf32>
    %69 = vector.broadcast %65 : vector<8x1xf32> to vector<8x256xf32>
    %70 = arith.mulf %57, %69 : vector<8x256xf32>
    %71 = vector.broadcast %68 : vector<8x1xf32> to vector<8x256xf32>
    %72 = arith.addf %70, %71 : vector<8x256xf32>
    %cst_21 = arith.constant 0.000000e+00 : f32
    %73 = vector.broadcast %cst_21 : f32 to vector<8x256xf32>
    %74 = arith.maximumf %72, %73 : vector<8x256xf32>
    %cst_22 = arith.constant dense<0.000000e+00> : vector<8x256xf32>
    %75 = tpu.matmul %5, %74, %cst_22 {dimension_numbers = #tpu.dot_dimension_numbers<[1], [0], [0], [1], [0, 0, 1, 1], [], []>} : vector<8x8xf32>, vector<8x256xf32>, vector<8x256xf32> -> vector<8x256xf32>
    %cst_23 = arith.constant dense<0.000000e+00> : vector<8x1xf32>
    %76 = tpu.matmul %75, %2, %cst_23 {dimension_numbers = #tpu.dot_dimension_numbers<[1], [0], [0], [1], [0, 0, 1, 1], [], []>} : vector<8x256xf32>, vector<256x1xf32>, vector<8x1xf32> -> vector<8x1xf32>
    %77 = arith.mulf %75, %75 : vector<8x256xf32>
    %cst_24 = arith.constant dense<0.000000e+00> : vector<8x1xf32>
    %78 = tpu.matmul %77, %2, %cst_24 {dimension_numbers = #tpu.dot_dimension_numbers<[1], [0], [0], [1], [0, 0, 1, 1], [], []>} : vector<8x256xf32>, vector<256x1xf32>, vector<8x1xf32> -> vector<8x1xf32>
    %79 = arith.mulf %76, %76 : vector<8x1xf32>
    %80 = arith.subf %78, %79 : vector<8x1xf32>
    %cst_25 = arith.constant 9.99999974E-6 : f32
    %81 = vector.broadcast %cst_25 : f32 to vector<8x1xf32>
    %82 = arith.addf %80, %81 : vector<8x1xf32>
    %83 = math.rsqrt %82 : vector<8x1xf32>
    %cst_26 = arith.constant 0.000000e+00 : f32
    %84 = vector.broadcast %cst_26 : f32 to vector<8x1xf32>
    %85 = arith.subf %84, %76 : vector<8x1xf32>
    %86 = arith.mulf %85, %83 : vector<8x1xf32>
    %87 = vector.broadcast %83 : vector<8x1xf32> to vector<8x256xf32>
    %88 = arith.mulf %75, %87 : vector<8x256xf32>
    %89 = vector.broadcast %86 : vector<8x1xf32> to vector<8x256xf32>
    %90 = arith.addf %88, %89 : vector<8x256xf32>
    %cst_27 = arith.constant 0.000000e+00 : f32
    %91 = vector.broadcast %cst_27 : f32 to vector<8x256xf32>
    %92 = arith.maximumf %90, %91 : vector<8x256xf32>
    %c0_28 = arith.constant 0 : index
    %c0_29 = arith.constant 0 : index
    %93 = vector.load %arg8[%c0_28, %c0_29] : memref<8x4xf32, #tpu.memory_space<vmem>>, vector<8x4xf32>
    %cst_30 = arith.constant dense<0.000000e+00> : vector<8x256xf32>
    %94 = tpu.matmul %93, %0, %cst_30 {dimension_numbers = #tpu.dot_dimension_numbers<[1], [0], [0], [1], [0, 0, 1, 1], [], []>} : vector<8x4xf32>, vector<4x256xf32>, vector<8x256xf32> -> vector<8x256xf32>
    %c0_31 = arith.constant 0 : index
    %c0_32 = arith.constant 0 : index
    %95 = vector.load %arg9[%c0_31, %c0_32] : memref<8x1xf32, #tpu.memory_space<vmem>>, vector<8x1xf32>
    %96 = vector.broadcast %95 : vector<8x1xf32> to vector<8x256xf32>
    %97 = arith.addf %94, %96 : vector<8x256xf32>
    %98 = arith.addf %92, %97 : vector<8x256xf32>
    %c0_33 = arith.constant 0 : index
    %c0_34 = arith.constant 0 : index
    %99 = vector.load %arg10[%c0_33, %c0_34] : memref<8x256xf32, #tpu.memory_space<vmem>>, vector<8x256xf32>
    tpu.vector_store %arg10[%c0_33, %c0_34], %98 {strides = array<i32>} : memref<8x256xf32, #tpu.memory_space<vmem>>, vector<8x256xf32>,
    return
  }
  func.func @transform_0(%arg0: i32) -> (i32, i32) {
    %c0_i32 = arith.constant 0 : i32
    %c0_i32_0 = arith.constant 0 : i32
    return %c0_i32, %arg0 : i32, i32
  }
  func.func @transform_1(%arg0: i32) -> (i32, i32) {
    %c0_i32 = arith.constant 0 : i32
    %c0_i32_0 = arith.constant 0 : i32
    %c0_i32_1 = arith.constant 0 : i32
    return %c0_i32, %c0_i32_0 : i32, i32
  }
  func.func @transform_2(%arg0: i32) -> (i32, i32) {
    %c0_i32 = arith.constant 0 : i32
    %c0_i32_0 = arith.constant 0 : i32
    %c0_i32_1 = arith.constant 0 : i32
    return %c0_i32, %c0_i32_0 : i32, i32
  }
  func.func @transform_3(%arg0: i32) -> (i32, i32) {
    %c0_i32 = arith.constant 0 : i32
    %c0_i32_0 = arith.constant 0 : i32
    %c0_i32_1 = arith.constant 0 : i32
    return %c0_i32, %c0_i32_0 : i32, i32
  }
  func.func @transform_4(%arg0: i32) -> (i32, i32) {
    %c0_i32 = arith.constant 0 : i32
    %c0_i32_0 = arith.constant 0 : i32
    %c0_i32_1 = arith.constant 0 : i32
    return %c0_i32, %c0_i32_0 : i32, i32
  }
  func.func @transform_5(%arg0: i32) -> (i32, i32) {
    %c0_i32 = arith.constant 0 : i32
    %c0_i32_0 = arith.constant 0 : i32
    %c0_i32_1 = arith.constant 0 : i32
    return %c0_i32, %c0_i32_0 : i32, i32
  }
  func.func @transform_6(%arg0: i32) -> (i32, i32) {
    %c0_i32 = arith.constant 0 : i32
    %c0_i32_0 = arith.constant 0 : i32
    %c0_i32_1 = arith.constant 0 : i32
    return %c0_i32, %c0_i32_0 : i32, i32
  }
  func.func @transform_7(%arg0: i32) -> (i32, i32) {
    %c0_i32 = arith.constant 0 : i32
    %c0_i32_0 = arith.constant 0 : i32
    %c0_i32_1 = arith.constant 0 : i32
    return %c0_i32, %c0_i32_0 : i32, i32
  }
  func.func @transform_8(%arg0: i32) -> (i32, i32) {
    %c0_i32 = arith.constant 0 : i32
    %c0_i32_0 = arith.constant 0 : i32
    %c0_i32_1 = arith.constant 0 : i32
    return %c0_i32, %c0_i32_0 : i32, i32
  }
  func.func @transform_9(%arg0: i32) -> (i32, i32) {
    %c0_i32 = arith.constant 0 : i32
    %c0_i32_0 = arith.constant 0 : i32
    return %c0_i32, %arg0 : i32, i32
  }
}

</mosaic_0001>

<bundles_post_ra>
// kernel: tpu_custom_call.1
= control target key start
LH: loop header
LB: loop body
LE: loop exit
PB: predicated region body
PF: predicated region fallthrough
CT: control target
= control target key end

     0   :  { %s3193_s0 = inlined_call_operand.hbm [shape: f32[4,512], index: 0, kind: input, shape index: {}]   ;;  %s3194_s1 = inlined_call_operand.hbm [shape: f32[9,256], index: 1, kind: input, shape index: {}]   ;;  %s3195_s2 = inlined_call_operand.hbm [shape: f32[256,1], index: 2, kind: input, shape index: {}]   ;;  %s3196_s3 = inlined_call_operand.hbm [shape: f32[1,256], index: 3, kind: input, shape index: {}]   ;;  %s3197_s4 = inlined_call_operand.hbm [shape: f32[8,4], index: 4, kind: input, shape index: {}]   ;;  %s3198_s5 = inlined_call_operand.hbm [shape: f32[8,72], index: 5, kind: input, shape index: {}]   ;;  %s3199_s6 = inlined_call_operand.hbm [shape: f32[8,8], index: 6, kind: input, shape index: {}]   ;;  %s3200_s7 = inlined_call_operand.hbm [shape: f32[8,4], index: 7, kind: input, shape index: {}]   ;;  %s3201_s8 = inlined_call_operand.hbm [shape: f32[8,1], index: 8, kind: input, shape index: {}]   ;;  %s3202_s9 = inlined_call_operand.hbm [shape: f32[8,512], index: 9, kind: output, shape index: {}]  }
   0x1   :  { %3207 = sst [smem:[#allocation24_spill]] %s3194_s1 }
   0x2   :  { %3208 = sst [smem:[#allocation25_spill]] %s3196_s3 }
   0x3   :  { %3209 = sst [smem:[#allocation26_spill]] %s3202_s9 }
   0x4   :  { %14 = vsyncpa [#allocation3], 0 }
   0x5   :  { %16 = vsyncpa [#allocation3 + $0x1], 0 }
   0x6   :  { %17 = vsyncpa [#allocation6], 0 }
   0x7   :  { %18 = vsyncpa [#allocation9], 0 }
   0x8   :  { %19 = vsyncpa [#allocation12], 0 }
   0x9   :  { %20 = vsyncpa [#allocation15], 0 }
   0xa   :  { %21 = vsyncpa [#allocation4], 0 }
   0xb   :  { %23 = vsyncpa [#allocation4 + $0x1], 0  ;;  %s2625_s30 = smov 0   ;;  %s2627_s10 = smov 0  }
   0xc   :  { %s2629_s11 = smov 0   ;;  %s2631_s12 = smov 0  }
   0xd LB: > { %s2551_s13 = smov [#allocation5]   ;;  %s2646_s15 = sadd.s32 4294967295, %s2549_s12   ;;  %s2549_s12 = sphi %s2631_s12, %s3237_s12   ;;  %s2545_s11 = sphi %s2629_s11, %s3236_s11   ;;  %s2541_s10 = sphi %s2627_s10, %s3235_s10   ;;  %s2537_s30 = sphi %s2625_s30, %s3234_s30  }
   0xe   : > { %s266_s14 = sshll.u32 %s2551_s13, 4  ;;  %p1604_p0 = scmp.ge.s32.totalorder %s2549_s12, 1  ;;  %s2651_s14 = int_to_ptr.vmem [resolvable:$true] %s266_s14 }
   0xf   : > { %p3204_p1 = scmp.eq.s32.totalorder %s2646_s15, 0  ;;  %p254_p2 = scmp.lt.s32.totalorder %s2549_s12, 3 }
  0x10   : > { %s2552_s17 = smov [#allocation8]   ;;  %s2553_s20 = smov [#allocation11]  }
  0x11   : > { %p2653_p3 = pnand %p1604_p0, %p254_p2  ;;  %s293_s18 = sshll.u32 %s2552_s17, 4  ;;  %s2666_s18 = int_to_ptr.vmem [resolvable:$true] %s293_s18 }
  0x12   : > { %s315_s21 = sshll.u32 %s2553_s20, 4  ;;  %s3212_s1 = sld [smem:[#allocation24_spill]]  ;;  %s2668_s21 = int_to_ptr.vmem [resolvable:$true] %s315_s21 }
  0x13   : > { %s3210_s16 = scalar_select %p2653_p3, 1, 0 }
  0x14   : > { %p2099_p5 = pneg %p2653_p3 }
  0x16   : > { %p2662_p6 = pnand %p2099_p5, %p3204_p1 }
  0x18   : > { %s2213_s24 = scalar_lea.hbm %s3212_s1, 512  ;;  %p2678_p8 = pneg %p2662_p6 }
  0x19   : > { %p2214_p7 = scmp.ne.s32.totalorder %s3212_s1, %s2213_s24  ;;  %p2220_p11 = scmp.lt.u32.totalorder %s2213_s24, %s3212_s1 }
  0x1b   : > { %p2216_p9 = pnand %p2678_p8, %p2214_p7 }
  0x1d   : > { %p2217_p10 = pneg %p2216_p9 }
  0x1f   : > { %p2222_p12 = pnand %p2220_p11, %p2217_p10 }
  0x21   : > { %2225 = shalt.err (!%p2222_p12)
}
  0x22   : > { %s2226_s13 = scalar_lea.vmem %s2651_s14, 512  ;;  %p2234_p5 = scmp.lt.s32.totalorder %s2651_s14, %s2651_s14 }
  0x23   : > { %p2227_p13 = scmp.ne.s32.totalorder %s2651_s14, %s2226_s13  ;;  %p2235_p4 = scmp.lt.s32.totalorder %s2226_s13, %s2226_s13 }
  0x25   : > { %p2229_p0 = pnand %p2227_p13, %p2678_p8  ;;  %p2236_p7 = por %p2235_p4, %p2234_p5 }
  0x27   : > { %p2230_p2 = pneg %p2229_p0 }
  0x29   : > { %p2237_p9 = pnand %p2236_p7, %p2230_p2 }
  0x2b   : > { %2240 = shalt.err (!%p2237_p9)
}
  0x2c   : > { %s2554_s17 = smov 256   ;;  %s2555_s20 = smov 16  }
  0x2d   : > { %2102 = dma.hbm_to_vmem [thread:$0]  (!%p2662_p6), %s3212_s1, 512, %s2651_s14, [#allocation6], %s2554_s17, %s2554_s17, %s2555_s20  }
  0x2e   : > { %s3214_s3 = sld [smem:[#allocation25_spill]] }
  0x34   : > { %s2241_s26 = scalar_lea.hbm %s3214_s3, 32 }
  0x35   : > { %p2242_p4 = scmp.ne.s32.totalorder %s3214_s3, %s2241_s26  ;;  %p2248_p12 = scmp.lt.u32.totalorder %s2241_s26, %s3214_s3 }
  0x37   : > { %p2244_p10 = pnand %p2242_p4, %p2678_p8 }
  0x39   : > { %p2245_p11 = pneg %p2244_p10 }
  0x3b   : > { %p2250_p13 = pnand %p2248_p12, %p2245_p11 }
  0x3d   : > { %2253 = shalt.err (!%p2250_p13)
}
  0x3e   : > { %s2254_s14 = scalar_lea.vmem %s2666_s18, 32  ;;  %p2262_p7 = scmp.lt.s32.totalorder %s2666_s18, %s2666_s18 }
  0x3f   : > { %p2255_p0 = scmp.ne.s32.totalorder %s2666_s18, %s2254_s14  ;;  %p2263_p9 = scmp.lt.s32.totalorder %s2254_s14, %s2254_s14 }
  0x41   : > { %p2257_p2 = pnand %p2255_p0, %p2678_p8  ;;  %p2264_p4 = por %p2263_p9, %p2262_p7 }
  0x43   : > { %p2258_p5 = pneg %p2257_p2 }
  0x45   : > { %p2265_p10 = pnand %p2264_p4, %p2258_p5 }
  0x47   : > { %2268 = shalt.err (!%p2265_p10)
}
  0x48   : > { %2108 = dma.hbm_to_vmem [thread:$0]  (!%p2662_p6), %s3214_s3, 32, %s2666_s18, [#allocation9]  }
  0x49   : > { %s2269_s23 = scalar_lea.hbm %s3198_s5, 128 }
  0x4a   : > { %p2270_p11 = scmp.ne.s32.totalorder %s3198_s5, %s2269_s23  ;;  %p2276_p0 = scmp.lt.u32.totalorder %s2269_s23, %s3198_s5 }
  0x4c   : > { %p2272_p12 = pnand %p2270_p11, %p2678_p8 }
  0x4e   : > { %p2273_p13 = pneg %p2272_p12 }
  0x50   : > { %p2278_p2 = pnand %p2276_p0, %p2273_p13 }
  0x52   : > { %2281 = shalt.err (!%p2278_p2)
}
  0x53   : > { %s2282_s18 = scalar_lea.vmem %s2668_s21, 128  ;;  %p2290_p4 = scmp.lt.s32.totalorder %s2668_s21, %s2668_s21 }
  0x54   : > { %p2283_p5 = scmp.ne.s32.totalorder %s2668_s21, %s2282_s18  ;;  %p2291_p10 = scmp.lt.s32.totalorder %s2282_s18, %s2282_s18 }
  0x56   : > { %p2285_p7 = pnand %p2283_p5, %p2678_p8  ;;  %p2292_p11 = por %p2291_p10, %p2290_p4 }
  0x58   : > { %p2286_p9 = pneg %p2285_p7 }
  0x5a   : > { %p2293_p12 = pnand %p2292_p11, %p2286_p9 }
  0x5c   : > { %2296 = shalt.err (!%p2293_p12)
}
  0x5d   : > { %2114 = dma.hbm_to_vmem [thread:$0]  (!%p2662_p6), %s3198_s5, 128, %s2668_s21, [#allocation12]  }
  0x5e   : > { %s2556_s14 = smov [#allocation14]   ;;  %s2557_s17 = smov [#allocation7]  }
  0x5f   : > { %s337_s9 = sshll.u32 %s2556_s14, 4  ;;  %s279_s20 = sshll.u32 %s2557_s17, 4  ;;  %s338_s9 = int_to_ptr.vmem [resolvable:$true] %s337_s9  ;;  %s280_s20 = int_to_ptr.vmem [resolvable:$true] %s279_s20 }
  0x60   : > { %s2297_s24 = scalar_lea.hbm %s3200_s7, 128 }
  0x61   : > { %p2298_p13 = scmp.ne.s32.totalorder %s3200_s7, %s2297_s24  ;;  %p2304_p5 = scmp.lt.u32.totalorder %s2297_s24, %s3200_s7 }
  0x63   : > { %p2300_p0 = pnand %p2298_p13, %p2678_p8 }
  0x65   : > { %p2301_p2 = pneg %p2300_p0 }
  0x67   : > { %p2306_p7 = pnand %p2304_p5, %p2301_p2 }
  0x69   : > { %2309 = shalt.err (!%p2306_p7)
}
  0x6a   : > { %s2310_s21 = scalar_lea.vmem %s338_s9, 128  ;;  %p2318_p11 = scmp.lt.s32.totalorder %s338_s9, %s338_s9 }
  0x6b   : > { %p2311_p9 = scmp.ne.s32.totalorder %s338_s9, %s2310_s21  ;;  %p2319_p12 = scmp.lt.s32.totalorder %s2310_s21, %s2310_s21 }
  0x6d   : > { %p2313_p4 = pnand %p2311_p9, %p2678_p8  ;;  %p2320_p1 = por %p2319_p12, %p2318_p11 }
  0x6f   : > { %p2314_p10 = pneg %p2313_p4 }
  0x71   : > { %p2321_p3 = pnand %p2320_p1, %p2314_p10 }
  0x73   : > { %2324 = shalt.err (!%p2321_p3)
}
  0x74   : > { %2120 = dma.hbm_to_vmem [thread:$0]  (!%p2662_p6), %s3200_s7, 128, %s338_s9, [#allocation15]  }
  0x75   : > { %s2325_s22 = scalar_lea.hbm %s3195_s2, 4096 }
  0x76   : > { %p2326_p13 = scmp.ne.s32.totalorder %s3195_s2, %s2325_s22  ;;  %p2332_p3 = scmp.lt.u32.totalorder %s2325_s22, %s3195_s2 }
  0x78   : > { %p2328_p0 = pnand %p2326_p13, %p2678_p8 }
  0x7a   : > { %p2329_p1 = pneg %p2328_p0 }
  0x7c   : > { %p2334_p2 = pnand %p2332_p3, %p2329_p1 }
  0x7e   : > { %2337 = shalt.err (!%p2334_p2)
}
  0x7f   : > { %s2338_s28 = scalar_lea.vmem %s280_s20, 4096  ;;  %p2346_p4 = scmp.lt.s32.totalorder %s280_s20, %s280_s20 }
  0x80   : > { %p2339_p5 = scmp.ne.s32.totalorder %s280_s20, %s2338_s28  ;;  %p2347_p10 = scmp.lt.s32.totalorder %s2338_s28, %s2338_s28 }
  0x82   : > { %p2341_p7 = pnand %p2339_p5, %p2678_p8  ;;  %p2348_p11 = por %p2347_p10, %p2346_p4 }
  0x84   : > { %p2342_p9 = pneg %p2341_p7 }
  0x86   : > { %p2349_p12 = pnand %p2348_p11, %p2342_p9 }
  0x88   : > { %2352 = shalt.err (!%p2349_p12)
}
  0x89   : > { %s2558_s9 = smov 128   ;;  %s2559_s18 = smov 8  }
  0x8a   : > { %2105 = dma.hbm_to_vmem [thread:$0]  (!%p2662_p6), %s3195_s2, 4096, %s280_s20, [#allocation6], %s2558_s9, %s2558_s9, %s2559_s18  }
  0x8b   : > { %s2560_s13 = smov [#allocation10]   ;;  %s2561_s17 = smov [#allocation13]  }
  0x8c   : > { %s304_s14 = sshll.u32 %s2560_s13, 4  ;;  %s326_s22 = sshll.u32 %s2561_s17, 4  ;;  %s305_s14 = int_to_ptr.vmem [resolvable:$true] %s304_s14  ;;  %s327_s22 = int_to_ptr.vmem [resolvable:$true] %s326_s22 }
  0x8d   : > { %s2353_s25 = scalar_lea.hbm %s3197_s4, 128 }
  0x8e   : > { %p2354_p13 = scmp.ne.s32.totalorder %s3197_s4, %s2353_s25  ;;  %p2360_p3 = scmp.lt.u32.totalorder %s2353_s25, %s3197_s4 }
  0x90   : > { %p2356_p0 = pnand %p2354_p13, %p2678_p8 }
  0x92   : > { %p2357_p1 = pneg %p2356_p0 }
  0x94   : > { %p2362_p2 = pnand %p2360_p3, %p2357_p1 }
  0x96   : > { %2365 = shalt.err (!%p2362_p2)
}
  0x97   : > { %s2366_s20 = scalar_lea.vmem %s305_s14, 128  ;;  %p2374_p4 = scmp.lt.s32.totalorder %s305_s14, %s305_s14 }
  0x98   : > { %p2367_p5 = scmp.ne.s32.totalorder %s305_s14, %s2366_s20  ;;  %p2375_p10 = scmp.lt.s32.totalorder %s2366_s20, %s2366_s20 }
  0x9a   : > { %p2369_p7 = pnand %p2367_p5, %p2678_p8  ;;  %p2376_p11 = por %p2375_p10, %p2374_p4 }
  0x9c   : > { %p2370_p9 = pneg %p2369_p7 }
  0x9e   : > { %p2377_p12 = pnand %p2376_p11, %p2370_p9 }
  0xa0   : > { %2380 = shalt.err (!%p2377_p12)
}
  0xa1   : > { %2111 = dma.hbm_to_vmem [thread:$0]  (!%p2662_p6), %s3197_s4, 128, %s305_s14, [#allocation9]  }
  0xa2   : > { %s2381_s21 = scalar_lea.hbm %s3199_s6, 128 }
  0xa3   : > { %p2382_p13 = scmp.ne.s32.totalorder %s3199_s6, %s2381_s21  ;;  %p2388_p3 = scmp.lt.u32.totalorder %s2381_s21, %s3199_s6 }
  0xa5   : > { %p2384_p0 = pnand %p2382_p13, %p2678_p8 }
  0xa7   : > { %p2385_p1 = pneg %p2384_p0 }
  0xa9   : > { %p2390_p2 = pnand %p2388_p3, %p2385_p1 }
  0xab   : > { %2393 = shalt.err (!%p2390_p2)
}
  0xac   : > { %s2394_s24 = scalar_lea.vmem %s327_s22, 128  ;;  %p2402_p4 = scmp.lt.s32.totalorder %s327_s22, %s327_s22 }
  0xad   : > { %p2395_p5 = scmp.ne.s32.totalorder %s327_s22, %s2394_s24  ;;  %p2403_p10 = scmp.lt.s32.totalorder %s2394_s24, %s2394_s24 }
  0xaf   : > { %p2397_p7 = pnand %p2395_p5, %p2678_p8  ;;  %p2404_p11 = por %p2403_p10, %p2402_p4 }
  0xb1   : > { %p2398_p9 = pneg %p2397_p7 }
  0xb3   : > { %p2405_p12 = pnand %p2404_p11, %p2398_p9 }
  0xb5   : > { %2408 = shalt.err (!%p2405_p12)
}
  0xb6   : > { %2117 = dma.hbm_to_vmem [thread:$0]  (!%p2662_p6), %s3199_s6, 128, %s327_s22, [#allocation12]  }
  0xb7   : > { %s2562_s26 = smov [#allocation16]   ;;  %s2409_s18 = scalar_lea.hbm %s3201_s8, 128 }
  0xb8   : > { %s348_s28 = sshll.u32 %s2562_s26, 4  ;;  %p2410_p13 = scmp.ne.s32.totalorder %s3201_s8, %s2409_s18  ;;  %s349_s28 = int_to_ptr.vmem [resolvable:$true] %s348_s28 }
  0xb9   : > { %p2416_p3 = scmp.lt.u32.totalorder %s2409_s18, %s3201_s8 }
  0xba   : > { %p2412_p0 = pnand %p2410_p13, %p2678_p8 }
  0xbc   : > { %p2413_p1 = pneg %p2412_p0 }
  0xbe   : > { %p2418_p2 = pnand %p2416_p3, %p2413_p1 }
  0xc0   : > { %2421 = shalt.err (!%p2418_p2)
}
  0xc1   : > { %s2422_s22 = scalar_lea.vmem %s349_s28, 128  ;;  %p2430_p4 = scmp.lt.s32.totalorder %s349_s28, %s349_s28 }
  0xc2   : > { %p2423_p5 = scmp.ne.s32.totalorder %s349_s28, %s2422_s22  ;;  %p2431_p10 = scmp.lt.s32.totalorder %s2422_s22, %s2422_s22 }
  0xc4   : > { %p2425_p7 = pnand %p2423_p5, %p2678_p8  ;;  %p2432_p11 = por %p2431_p10, %p2430_p4 }
  0xc6   : > { %p2426_p9 = pneg %p2425_p7 }
  0xc8   : > { %p2433_p12 = pnand %p2432_p11, %p2426_p9 }
  0xca   : > { %2436 = shalt.err (!%p2433_p12)
}
  0xcb   : > { %2123 = dma.hbm_to_vmem [thread:$0]  (!%p2662_p6), %s3201_s8, 128, %s349_s28, [#allocation15]  }
  0xcc   : > { %s1603_s27 = sadd.s32 4294967294, %s2549_s12   ;;  %s2837_s19 = sadd.s32 1, %s2549_s12  }
  0xcd   : > { %s33_s23 = ssub.s32 %s2549_s12, %s2837_s19  ;;  %s36_s24 = sadd.s32 1, %s2545_s11 }
  0xce   : > { %p34_p8 = scmp.eq.s32.totalorder %s33_s23, 0  ;;  %p43_p13 = scmp.ne.s32.totalorder %s2545_s11, %s2541_s10 }
  0xcf   : > { %p44_p0 = scmp.eq.s32.totalorder %s2549_s12, 0  ;;  %p49_p1 = scmp.ne.s32.totalorder %s2541_s10, %s2537_s30 }
  0xd0   : > { %s2848_s14 = scalar_select %p34_p8, %s2545_s11, %s36_s24  }
  0xd1   : > { %p2850_p3 = por %p44_p0, %p43_p13  ;;  %p3216_p2 = scmp.eq.s32.totalorder %s2646_s15, 0 }
  0xd2   : > { %p241_p5 = scmp.eq.s32.totalorder %s2646_s15, 1  ;;  %p247_p7 = scmp.eq.s32.totalorder %s1603_s27, 1 }
  0xd3   : > { %p2856_p6 = por %p3216_p2, %p49_p1  ;;  %p2140_p9 = scmp.lt.s32.totalorder %s2549_s12, 2 }
  0xd4   : > { %s359_s28 = sand.u32 1, %s2545_s11   ;;  %p2863_p4 = por %p241_p5, %p43_p13 }
  0xd5   : > { %p2867_p10 = por %p247_p7, %p49_p1  ;;  %s1614_s18 = sshll.u32 %s359_s28, 3 }
  0xd6   : > { %s3218_s20 = scalar_select %p2863_p4, 1, 0 }
  0xd7   : > { %s3219_s9 = scalar_select %p2867_p10, 1, 0 }
  0xd8   : > { %s1643_s1 = sshll.u32 %s2549_s12, 7  ;;  %s363_s22 = scalar_lea.vmem [#allocation2], %s1614_s18 }
  0xd9   : > { %s2875_s29 = scalar_lea.hbm %s3193_s0, %s1643_s1  ;;  %s371_s13 = sshll.u32 %s363_s22, 4  ;;  %s2877_s13 = int_to_ptr.vmem [resolvable:$true] %s371_s13 }
  0xda   : > { %p2881_p11 = pnand %p2140_p9, %p2850_p3  ;;  %s360_s27 = scalar_lea.sflag [#allocation3], %s359_s28 }
  0xdb   : > { %s2437_s23 = scalar_lea.hbm %s2875_s29, 128  ;;  %s2442_s1 = scalar_lea.hbm %s3193_s0, 256 }
  0xdc   : > { %p2438_p12 = scmp.ne.s32.totalorder %s2875_s29, %s2437_s23  ;;  %p2439_p8 = pneg %p2881_p11 }
  0xdd   : > { %p2443_p1 = scmp.lt.u32.totalorder %s2875_s29, %s3193_s0  ;;  %p2444_p3 = scmp.lt.u32.totalorder %s2442_s1, %s2437_s23 }
  0xde   : > { %p2440_p13 = pnand %p2439_p8, %p2438_p12  ;;  %p2446_p5 = scmp.lt.u32.totalorder %s2437_s23, %s2875_s29 }
  0xdf   : > { %p2445_p2 = por %p2444_p3, %p2443_p1 }
  0xe0   : > { %p2441_p0 = pneg %p2440_p13 }
  0xe1   : > { %p2447_p7 = por %p2446_p5, %p2445_p2 }
  0xe3   : > { %p2448_p9 = pnand %p2447_p7, %p2441_p0 }
  0xe5   : > { %2451 = shalt.err (!%p2448_p9)
}
  0xe6   : > { %s2452_s28 = scalar_lea.vmem %s2877_s13, 128  ;;  %s2563_s21 = smov [#allocation2]  }
  0xe7   : > { %p2453_p12 = scmp.ne.s32.totalorder %s2877_s13, %s2452_s28  ;;  %s2457_s22 = sshll.u32 %s2563_s21, 4  ;;  %s2458_s22 = int_to_ptr.vmem [resolvable:$false] %s2457_s22 }
  0xe8   : > { %s2459_s24 = scalar_lea.vmem %s2458_s22, 256  ;;  %p2460_p4 = scmp.lt.s32.totalorder %s2877_s13, %s2458_s22 }
  0xe9   : > { %p2455_p13 = pnand %p2453_p12, %p2439_p8  ;;  %p2461_p1 = scmp.lt.s32.totalorder %s2459_s24, %s2452_s28 }
  0xeb   : > { %p2456_p10 = pneg %p2455_p13  ;;  %p2462_p3 = por %p2461_p1, %p2460_p4 }
  0xed   : > { %p2463_p2 = pnand %p2462_p3, %p2456_p10 }
  0xef   : > { %2466 = shalt.err (!%p2463_p2)
}
  0xf0   : > { %2127 = dma.hbm_to_vmem [thread:$0]  (!%p2881_p11), %s2875_s29, 128, %s2877_s13, %s360_s27  }
  0xf1   : > { %p3221_p0 = scmp.ne.s32.totalorder %s3210_s16, 0 }
  0xf2   : > { %s2913_s23 = sand.u32 (!%p3221_p0), 1, %s2541_s10  }
  0xf3   : > { %380 = sbr.rel (%p3221_p0) target bundleno = 2182 (0x886), region = 56  ;;  %s1618_s18 = sshll.u32 (!%p3221_p0), %s2913_s23, 3 }
  0xf4   : > { %s383_s1 = scalar_lea.sflag (!%p3221_p0), [#allocation3], %s2913_s23  ;;  %s386_s25 = scalar_lea.vmem (!%p3221_p0), [#allocation2], %s1618_s18 }
  0xfa   : > { %2512 = dma.done.wait (%p2856_p6), %s383_s1, 128  }
  0xfb   : > { %2514 = vsyncadd (%p2856_p6), %s383_s1, 4294967168  ;;  %p3222_p4 = scmp.eq.s32.totalorder %s2646_s15, 0 }
  0xfd   : > { %2516 = dma.done.wait (%p3222_p4), [#allocation6], 4608   ;;  %p3223_p10 = pmov %p3222_p4 }
  0xfe   : > { %p3224_p11 = pmov %p3222_p4 }
  0xff   : > { %2518 = vsyncadd (%p3223_p10), [#allocation6], 4294962688 }
 0x100   : > { %2520 = dma.done.wait (%p3224_p11), [#allocation9], 160   ;;  %p3225_p8 = pmov %p3222_p4 }
 0x101   : > { %p3226_p5 = pmov %p3222_p4 }
 0x102   : > { %2522 = vsyncadd (%p3225_p8), [#allocation9], 4294967136 }
 0x103   : > { %2524 = dma.done.wait (%p3226_p5), [#allocation12], 256   ;;  %p3227_p7 = pmov %p3222_p4 }
 0x104   : > { %p3228_p6 = pmov %p3222_p4 }
 0x105   : > { %2526 = vsyncadd (%p3227_p7), [#allocation12], 4294967040 }
 0x106   : > { %2528 = dma.done.wait (%p3228_p6), [#allocation15], 256   ;;  %p3229_p9 = pmov %p3222_p4 }
 0x107   : > { %v2564_v0 = vmov 0.0   ;;  %v2938_v1 = vld [vmem:[%s386_s25] sm:$0xff]  ;;  %vm501_vm0 = vcmask 1043456   ;;  %v492_v2 = vld [vmem:[#allocation10] sm:$0xff]  ;;  %vm497_vm1 = vcmask 31744   ;;  %v2565_v56 = vmov 0  }
 0x108   : > { %2530 = vsyncadd (%p3229_p9), [#allocation15], 4294967040  ;;  %570 = vmatprep.mubr.f32.mxu0 %v2564_v0  ;;  %v476_v3 = vld [vmem:[#allocation7 + $0x80] sm:$0xff]  ;;  %v2942_v4 = vcombine.high %v2938_v1, %v2938_v1  ;;  %v477_v5 = vld [vmem:[#allocation7 + $0x88] sm:$0xff]  ;;  %2204 = vset.pattern.permute.xlu0 %v2565_v56  ;;  %s2566_s16 = smov 16   ;;  %s2567_s26 = smov 17  }
 0x109   : > { %v460_v6 = vld [vmem:[#allocation7] sm:$0xff]  ;;  %v461_v7 = vld [vmem:[#allocation7 + $0x8] sm:$0xff]  ;;  %v2944_v8 = vpack.c.bf16 %v477_v5, %v476_v3  ;;  %v478_v10 = vld [vmem:[#allocation7 + $0x90] sm:$0xff]  ;;  %2205 = vset.pattern.permute.xlu1 %v2565_v56  ;;  %s2568_s29 = smov 15   ;;  %s2569_s13 = smov 1   ;;  %vm879_vm10 = vcmask 588800  }
 0x10a   : > { %v2946_v9 = vpack.c.bf16 %v461_v7, %v460_v6  ;;  %v479_v11 = vld [vmem:[#allocation7 + $0x98] sm:$0xff]  ;;  %v462_v12 = vld [vmem:[#allocation7 + $0x10] sm:$0xff]  ;;  %1628 = vmatprep.subr.msk.mxu0 %vm501_vm0, %v2942_v4  ;;  %v480_v15 = vld [vmem:[#allocation7 + $0xa0] sm:$0xff]  ;;  %s2570_s17 = smov 127   ;;  %s2571_s27 = smov 113   ;;  %vm1118_vm11 = vcmask 64512  }
 0x10b   : > { %v2950_v13 = vpack.c.bf16 %v479_v11, %v478_v10  ;;  %v463_v14 = vld [vmem:[#allocation7 + $0x18] sm:$0xff]  ;;  %v481_v16 = vld [vmem:[#allocation7 + $0xa8] sm:$0xff]  ;;  %1629 = vmatpush1.msk.msra.mxu0 %vm501_vm0, %v2938_v1  ;;  %1856 = vmatprep.subr.bf16.mxu1 %v2944_v8  ;;  %v464_v19 = vld [vmem:[#allocation7 + $0x20] sm:$0xff]  ;;  %s2572_s3 = smov 112   ;;  %s2573_s28 = smov 111  }
 0x10c   : > { %1630 = vmatmul.mubr.msk.f32.vlgmr.msra.gmra.mrb[0].mxu0 %vm497_vm1, %v492_v2  ;;  %1858 = vmatpush3.bf16.msra.mxu1 %v2946_v9  ;;  %v2957_v17 = vpack.c.bf16 %v463_v14, %v462_v12  ;;  %v2961_v18 = vpack.c.bf16 %v481_v16, %v480_v15  ;;  %v465_v20 = vld [vmem:[#allocation7 + $0x28] sm:$0xff]  ;;  %v482_v21 = vld [vmem:[#allocation7 + $0xb0] sm:$0xff]  ;;  %v483_v22 = vld [vmem:[#allocation7 + $0xb8] sm:$0xff]  ;;  %s1627_s21 = sshll.u32 %s2913_s23, 4  ;;  %s1644_s22 = sshll.u32 %s2646_s15, 8 }
 0x10d   : > { %1888 = vmatprep.subr.bf16.mxu0 %v2944_v8  ;;  %1860 = vmatprep.subr.bf16.mxu1 %v2950_v13  ;;  %v2966_v23 = vpack.c.bf16 %v465_v20, %v464_v19  ;;  %v2969_v24 = vpack.c.bf16 %v483_v22, %v482_v21  ;;  %v466_v25 = vld [vmem:[#allocation7 + $0x30] sm:$0xff]  ;;  %v467_v26 = vld [vmem:[#allocation7 + $0x38] sm:$0xff]  ;;  %v484_v27 = vld [vmem:[#allocation7 + $0xc0] sm:$0xff]  ;;  %v745_v21 = vlaneseq  ;;  %s452_s24 = scalar_lea.vmem [#allocation17], %s1627_s21  ;;  %s1443_s15 = scalar_lea.sflag [#allocation4], %s2913_s23 }
 0x10e   : > { %1890 = vmatpush3.bf16.msra.mxu0 %v2946_v9  ;;  %v485_v28 = vld [vmem:[#allocation7 + $0xc8] sm:$0xff]  ;;  %v2974_v29 = vpack.c.bf16 %v467_v26, %v466_v25  ;;  %v468_v31 = vld [vmem:[#allocation7 + $0x40] sm:$0xff]  ;;  %v486_v33 = vld [vmem:[#allocation7 + $0xd0] sm:$0xff]  ;;  %s1457_s18 = sshll.u32 %s452_s24, 4  ;;  %p3231_p13 = scmp.ne.s32.totalorder %s3218_s20, 0  ;;  %s3151_s18 = int_to_ptr.vmem [resolvable:$true] %s1457_s18 }
 0x10f   : > { %1892 = vmatprep.subr.bf16.mxu0 %v2950_v13  ;;  %v2977_v30 = vpack.c.bf16 %v485_v28, %v484_v27  ;;  %v469_v32 = vld [vmem:[#allocation7 + $0x48] sm:$0xff]  ;;  %v487_v34 = vld [vmem:[#allocation7 + $0xd8] sm:$0xff]  ;;  %v470_v37 = vld [vmem:[#allocation7 + $0x50] sm:$0xff]  ;;  %v3050_v22 = vshrl.u32 %v745_v21, 7  ;;  %v3052_v27 = vand.u32 127, %v745_v21 }
 0x110   : > { %1862 = vmatpush3.bf16.msra.mxu1 %v2957_v17  ;;  %v2982_v35 = vpack.c.bf16 %v469_v32, %v468_v31  ;;  %v2985_v36 = vpack.c.bf16 %v487_v34, %v486_v33  ;;  %v471_v38 = vld [vmem:[#allocation7 + $0x58] sm:$0xff]  ;;  %v488_v39 = vld [vmem:[#allocation7 + $0xe0] sm:$0xff]  ;;  %v489_v40 = vld [vmem:[#allocation7 + $0xe8] sm:$0xff] }
 0x111   : > { %1864 = vmatprep.subr.bf16.mxu1 %v2961_v18  ;;  %v2990_v41 = vpack.c.bf16 %v471_v38, %v470_v37  ;;  %v2993_v42 = vpack.c.bf16 %v489_v40, %v488_v39  ;;  %v472_v43 = vld [vmem:[#allocation7 + $0x60] sm:$0xff]  ;;  %v473_v44 = vld [vmem:[#allocation7 + $0x68] sm:$0xff]  ;;  %v490_v45 = vld [vmem:[#allocation7 + $0xf0] sm:$0xff]  ;;  %v752_v28 = vsub.s32 0, %v3050_v22  ;;  %v769_v32 = vsub.s32 1, %v3050_v22 }
 0x112   : > { %1894 = vmatpush3.bf16.msra.mxu0 %v2957_v17  ;;  %v491_v46 = vld [vmem:[#allocation7 + $0xf8] sm:$0xff]  ;;  %v2998_v47 = vpack.c.bf16 %v473_v44, %v472_v43  ;;  %v474_v49 = vld [vmem:[#allocation7 + $0x70] sm:$0xff]  ;;  %v3055_v31 = vld [vmem:[#allocation5] sm:$0xff]  ;;  %vm747_vm2 = vcmp.lt.s32.totalorder %v3052_v27, 17  ;;  %vm764_vm3 = vcmp.lt.s32.totalorder %v3052_v27, 16  ;;  %vm781_vm4 = vcmp.lt.s32.totalorder %v3052_v27, 15 }
 0x113   : > { %1896 = vmatprep.subr.bf16.mxu0 %v2961_v18  ;;  %v3001_v48 = vpack.c.bf16 %v491_v46, %v490_v45  ;;  %v475_v50 = vld [vmem:[#allocation7 + $0x78] sm:$0xff]  ;;  %v3058_v33 = vld [vmem:[#allocation5 + $0x8] sm:$0xff]  ;;  %v753_v38 = vrot.slane %v3055_v31, %v752_v28  ;;  %v770_v40 = vrot.slane %v3055_v31, %v769_v32  ;;  %vm798_vm5 = vcmp.lt.s32.totalorder %v3052_v27, 1 }
 0x114   : > { %1866 = vmatpush3.bf16.msra.mxu1 %v2966_v23  ;;  %v3009_v51 = vpack.c.bf16 %v475_v50, %v474_v49  ;;  %v757_v39 = vrot.slane %v3058_v33, %v752_v28  ;;  %v774_v43 = vrot.slane %v3058_v33, %v769_v32  ;;  %vm815_vm6 = vcmp.lt.s32.totalorder %v3052_v27, 127 }
 0x115   : > { %1868 = vmatprep.subr.bf16.mxu1 %v2969_v24  ;;  %vm832_vm7 = vcmp.lt.s32.totalorder %v3052_v27, 113  ;;  %vm849_vm8 = vcmp.lt.s32.totalorder %v3052_v27, 112  ;;  %vm866_vm9 = vcmp.lt.s32.totalorder %v3052_v27, 111 }
 0x116   : > { %1898 = vmatpush3.bf16.msra.mxu0 %v2966_v23 }
 0x117   : > { %1900 = vmatprep.subr.bf16.mxu0 %v2969_v24 }
 0x118   : > { %1870 = vmatpush3.bf16.msra.mxu1 %v2974_v29 }
 0x119   : > { %1872 = vmatprep.subr.bf16.mxu1 %v2977_v30 }
 0x11a   : > { %1902 = vmatpush3.bf16.msra.mxu0 %v2974_v29 }
 0x11b   : > { %1904 = vmatprep.subr.bf16.mxu0 %v2977_v30 }
 0x11c   : > { %1874 = vmatpush3.bf16.msra.mxu1 %v2982_v35 }
 0x11d   : > { %1876 = vmatprep.subr.bf16.mxu1 %v2985_v36 }
 0x11e   : > { %1906 = vmatpush3.bf16.msra.mxu0 %v2982_v35 }
 0x11f   : > { %1908 = vmatprep.subr.bf16.mxu0 %v2985_v36 }
 0x120   : > { %1878 = vmatpush3.bf16.msra.mxu1 %v2990_v41 }
 0x121   : > { %1880 = vmatprep.subr.bf16.mxu1 %v2993_v42 }
 0x122   : > { %1910 = vmatpush3.bf16.msra.mxu0 %v2990_v41 }
 0x123   : > { %1912 = vmatprep.subr.bf16.mxu0 %v2993_v42 }
 0x124   : > { %1882 = vmatpush3.bf16.msra.mxu1 %v2998_v47 }
 0x125   : > { %1884 = vmatprep.subr.bf16.mxu1 %v3001_v48 }
 0x126   : > { %1914 = vmatpush3.bf16.msra.mxu0 %v2998_v47 }
 0x127   : > { %1916 = vmatprep.subr.bf16.mxu0 %v3001_v48 }
 0x128   : > { %1886 = vmatpush3.bf16.msra.mxu1 %v3009_v51 }
 0x12a   : > { %1918 = vmatpush3.bf16.msra.mxu0 %v3009_v51 }
 0x12b   : > { %1936 = vmatprep.subr.bf16.mxu0 %v2944_v8 }
 0x1df   : > { %v572_v52 = vpop.f32.mrb[0].mxu0 }
 0x1e0   : > { %v574_v53 = vpop.f32.mrb[1].mxu0  ;;  %v647_v55 = vmul.f32 %v572_v52, %v572_v52 }
 0x1e1   : > { %v648_v54 = vmul.f32 %v574_v53, %v574_v53  ;;  %641 = vmatprep.mubr.f32.mxu1 %v574_v53 }
 0x1e2   : > { %642 = vmatmul.mubr.f32.vlgmr.msra.gmra.mrb[0].mxu1 %v572_v52 }
 0x1e3   : > { %713 = vmatprep.mubr.f32.mxu0 %v648_v54  ;;  %947 = vmatprep.mubr.f32.mxu1 %v2564_v0  ;;  %v803_v54 = vsub.s32 3, %v3050_v22 }
 0x1e4   : > { %714 = vmatmul.mubr.f32.vlgmr.msra.gmra.mrb[2].mxu0 %v647_v55 }
 0x1e5   : > { %1938 = vmatpush3.bf16.msra.mxu0 %v2946_v9 }
 0x1e6   : > { %1940 = vmatprep.subr.bf16.mxu0 %v2950_v13 }
 0x1e9   : > { %1942 = vmatpush3.bf16.msra.mxu0 %v2957_v17 }
 0x1ea   : > { %1944 = vmatprep.subr.bf16.mxu0 %v2961_v18 }
 0x1ed   : > { %1946 = vmatpush3.bf16.msra.mxu0 %v2966_v23 }
 0x1ee   : > { %1948 = vmatprep.subr.bf16.mxu0 %v2969_v24 }
 0x1f1   : > { %1950 = vmatpush3.bf16.msra.mxu0 %v2974_v29 }
 0x1f2   : > { %1952 = vmatprep.subr.bf16.mxu0 %v2977_v30 }
 0x1f5   : > { %1954 = vmatpush3.bf16.msra.mxu0 %v2982_v35 }
 0x1f6   : > { %1956 = vmatprep.subr.bf16.mxu0 %v2985_v36 }
 0x1f9   : > { %1958 = vmatpush3.bf16.msra.mxu0 %v2990_v41 }
 0x1fa   : > { %1960 = vmatprep.subr.bf16.mxu0 %v2993_v42 }
 0x1fd   : > { %1962 = vmatpush3.bf16.msra.mxu0 %v2998_v47 }
 0x1fe   : > { %1964 = vmatprep.subr.bf16.mxu0 %v3001_v48 }
 0x201   : > { %1966 = vmatpush3.bf16.msra.mxu0 %v3009_v51 }
 0x2b5   : > { %v1677_v57 = vpop.f32.mrb[0].mxu1 }
 0x2b6   : > { %v1678_v58 = vpop.f32.mrb[1].mxu1 }
 0x2b7   : > { %v1679_v59 = vadd.f32 %v1678_v58, %v1677_v57  ;;  %v1712_v60 = vpop.f32.mrb[2].mxu0 }
 0x2b8   : > { %v1713_v61 = vpop.f32.mrb[3].mxu0 }
 0x2b9   : > { %v719_v62 = vmul.f32 %v1679_v59, %v1679_v59  ;;  %v1714_v63 = vadd.f32 %v1713_v61, %v1712_v60  ;;  %v723_v5 = vsub.f32 0.0, %v1679_v59 }
 0x2bb   : > { %v720_v2 = vsub.f32 %v1714_v63, %v719_v62  ;;  %v820_v63 = vsub.s32 5, %v3050_v22 }
 0x2bd   : > { %v721_v3 = vadd.f32 1e-05, %v720_v2 }
 0x2bf   : > { %2207 = vrsqrt.f32 %v721_v3 }
 0x2c9   : > { %v2208_v6 = vpop.eup %2207 }
 0x2ca   : > { %727 = vperm.xlu0 %2204, %v2208_v6   ;;  %v724_v7 = vmul.f32 %v2208_v6, %v723_v5  ;;  %v804_v5 = vrot.slane %v3055_v31, %v803_v54  ;;  %v808_v6 = vrot.slane %v3058_v33, %v803_v54 }
 0x2ce   : > { %734 = vperm.xlu0 %2204, %v724_v7  }
 0x349   : > { %v728_v10 = vpop.permute.xlu0 %727 }
 0x34a   : > { %v730_v11 = vmul.f32 %v728_v10, %v572_v52  ;;  %v731_v14 = vmul.f32 %v728_v10, %v574_v53  ;;  %v786_v53 = vsub.s32 2, %v3050_v22 }
 0x34c   : > { %v787_v62 = vrot.slane %v3055_v31, %v786_v53  ;;  %v791_v3 = vrot.slane %v3058_v33, %v786_v53 }
 0x34d   : > { %v735_v12 = vpop.permute.xlu0 %734 }
 0x34e   : > { %v737_v15 = vadd.f32 %v735_v12, %v730_v11  ;;  %v738_v16 = vadd.f32 %v735_v12, %v731_v14 }
 0x350   : > { %v3030_v19 = vmax.f32 %v737_v15, 0.0  ;;  %v3034_v20 = vmax.f32 %v738_v16, 0.0  ;;  %v821_v15 = vrot.slane %v3055_v31, %v820_v63  ;;  %v825_v16 = vrot.slane %v3058_v33, %v820_v63 }
 0x352   : > { %760 = vrot.lane.b32.xlu0 %v3030_v19, %s2566_s16  ;;  %741 = vrot.lane.b32.xlu1 %v3030_v19, %s2567_s26 }
 0x356   : > { %777 = vrot.lane.b32.xlu0 %v3030_v19, %s2568_s29  ;;  %743 = vrot.lane.b32.xlu1 %v3034_v20, %s2567_s26 }
 0x35a   : > { %794 = vrot.lane.b32.xlu0 %v3030_v19, %s2569_s13  ;;  %762 = vrot.lane.b32.xlu1 %v3034_v20, %s2566_s16  ;;  %s3230_s16 = sld [smem:[#allocation26_spill]] }
 0x35e   : > { %811 = vrot.lane.b32.xlu0 %v3030_v19, %s2570_s17  ;;  %779 = vrot.lane.b32.xlu1 %v3034_v20, %s2568_s29  ;;  %s2467_s29 = scalar_lea.vmem %s3151_s18, 256 }
 0x35f   : > { %p2468_p12 = scmp.ne.s32.totalorder %s3151_s18, %s2467_s29 }
 0x360   : > { %s3149_s26 = scalar_lea.hbm %s3230_s16, %s1644_s22 }
 0x361   : > { %p2469_p1 = pnand %p2468_p12, %p3231_p13 }
 0x362   : > { %828 = vrot.lane.b32.xlu0 %v3030_v19, %s2571_s27  ;;  %796 = vrot.lane.b32.xlu1 %v3034_v20, %s2569_s13  ;;  %s2574_s13 = smov [#allocation17]  }
 0x363   : > { %p2470_p3 = pneg %p2469_p1 }
 0x366   : > { %845 = vrot.lane.b32.xlu0 %v3030_v19, %s2572_s3  ;;  %813 = vrot.lane.b32.xlu1 %v3034_v20, %s2570_s17  ;;  %s2471_s17 = sshll.u32 %s2574_s13, 4  ;;  %s2472_s17 = int_to_ptr.vmem [resolvable:$false] %s2471_s17 }
 0x367   : > { %p2474_p2 = scmp.lt.s32.totalorder %s3151_s18, %s2472_s17 }
 0x36a   : > { %862 = vrot.lane.b32.xlu0 %v3030_v19, %s2573_s28  ;;  %830 = vrot.lane.b32.xlu1 %v3034_v20, %s2571_s27  ;;  %s2473_s27 = scalar_lea.vmem %s2472_s17, 512 }
 0x36b   : > { %p2475_p0 = scmp.lt.s32.totalorder %s2473_s27, %s2467_s29 }
 0x36d   : > { %p2476_p4 = por %p2475_p0, %p2474_p2 }
 0x36e   : > { %847 = vrot.lane.b32.xlu1 %v3034_v20, %s2572_s3 }
 0x36f   : > { %p2477_p10 = pnand %p2476_p4, %p2470_p3 }
 0x372   : > { %864 = vrot.lane.b32.xlu1 %v3034_v20, %s2573_s28 }
 0x3c4   : > { %v761_v25 = vpop.permute.xlu0 %760  ;;  %v742_v26 = vpop.permute.xlu1 %741 }
 0x3c8   : > { %v778_v34 = vpop.permute.xlu0 %777  ;;  %v744_v37 = vpop.permute.xlu1 %743 }
 0x3c9   : > { %v748_v44 = vsel %vm747_vm2, %v742_v26, %v744_v37  ;;  %v749_v45 = vsel %vm747_vm2, %v744_v37, %v742_v26 }
 0x3ca   : > { %v758_v55 = vmul.f32 %v753_v38, %v749_v45  ;;  %v759_v56 = vmul.f32 %v757_v39, %v748_v44 }
 0x3cc   : > { %v795_v46 = vpop.permute.xlu0 %794  ;;  %v763_v49 = vpop.permute.xlu1 %762 }
 0x3cd   : > { %v765_v50 = vsel %vm764_vm3, %v761_v25, %v763_v49  ;;  %v766_v52 = vsel %vm764_vm3, %v763_v49, %v761_v25 }
 0x3ce   : > { %v775_v57 = vmul.f32 %v770_v40, %v766_v52  ;;  %v776_v58 = vmul.f32 %v774_v43, %v765_v50  ;;  %v837_v43 = vsub.s32 6, %v3050_v22 }
 0x3d0   : > { %v1921_v59 = vpack.c.bf16 %v775_v57, %v758_v55  ;;  %v780_v60 = vpop.permute.xlu1 %779  ;;  %v1919_v61 = vpack.c.bf16 %v776_v58, %v759_v56  ;;  %v812_v2 = vpop.permute.xlu0 %811  ;;  %v838_v53 = vrot.slane %v3055_v31, %v837_v43  ;;  %v842_v55 = vrot.slane %v3058_v33, %v837_v43 }
 0x3d1   : > { %v782_v7 = vsel %vm781_vm4, %v778_v34, %v780_v60  ;;  %v783_v10 = vsel %vm781_vm4, %v780_v60, %v778_v34 }
 0x3d2   : > { %1920 = vmatprep.subr.bf16.mxu1 %v1919_v61  ;;  %v792_v21 = vmul.f32 %v787_v62, %v783_v10  ;;  %v793_v25 = vmul.f32 %v791_v3, %v782_v7  ;;  %v1631_v10 = vld [vmem:[#allocation5 + $0x10] ss:$0 sm:$0xff] }
 0x3d3   : > { %1922 = vmatpush1.bf16.msra.mxu1 %v1921_v59 }
 0x3d4   : > { %v797_v11 = vpop.permute.xlu1 %796  ;;  %v829_v32 = vpop.permute.xlu0 %828 }
 0x3d5   : > { %v799_v12 = vsel %vm798_vm5, %v795_v46, %v797_v11  ;;  %v800_v14 = vsel %vm798_vm5, %v797_v11, %v795_v46  ;;  %v854_v46 = vsub.s32 7, %v3050_v22 }
 0x3d6   : > { %v809_v26 = vmul.f32 %v804_v5, %v800_v14  ;;  %v810_v28 = vmul.f32 %v808_v6, %v799_v12  ;;  %v493_v14 = vld [vmem:[#allocation11] sm:$0xff] }
 0x3d7   : > { %v855_v56 = vrot.slane %v3055_v31, %v854_v46  ;;  %v859_v22 = vrot.slane %v3058_v33, %v854_v46 }
 0x3d8   : > { %v1925_v37 = vpack.c.bf16 %v809_v26, %v792_v21  ;;  %v814_v38 = vpop.permute.xlu1 %813  ;;  %v1923_v39 = vpack.c.bf16 %v810_v28, %v793_v25  ;;  %v846_v54 = vpop.permute.xlu0 %845 }
 0x3d9   : > { %v816_v40 = vsel %vm815_vm6, %v812_v2, %v814_v38  ;;  %v817_v34 = vsel %vm815_vm6, %v814_v38, %v812_v2  ;;  %v1632_v2 = vld [vmem:[#allocation5 + $0x18] ss:$0 sm:$0xff] }
 0x3da   : > { %v826_v44 = vmul.f32 %v821_v15, %v816_v40  ;;  %v827_v45 = vmul.f32 %v825_v16, %v817_v34  ;;  %1924 = vmatprep.subr.bf16.mxu1 %v1923_v39 }
 0x3db   : > { %1926 = vmatpush1.bf16.msra.mxu1 %v1925_v37 }
 0x3dc   : > { %v1929_v49 = vpack.c.bf16 %v826_v44, %v3030_v19  ;;  %v831_v50 = vpop.permute.xlu1 %830  ;;  %v1927_v52 = vpack.c.bf16 %v827_v45, %v3034_v20  ;;  %v863_v3 = vpop.permute.xlu0 %862 }
 0x3dd   : > { %v833_v57 = vsel %vm832_vm7, %v829_v32, %v831_v50  ;;  %v834_v58 = vsel %vm832_vm7, %v831_v50, %v829_v32 }
 0x3de   : > { %1928 = vmatprep.subr.bf16.mxu1 %v1927_v52  ;;  %v843_v20 = vmul.f32 %v838_v53, %v833_v57  ;;  %v844_v61 = vmul.f32 %v842_v55, %v834_v58 }
 0x3df   : > { %1930 = vmatpush1.bf16.msra.mxu1 %v1929_v49 }
 0x3e0   : > { %v848_v19 = vpop.permute.xlu1 %847 }
 0x3e1   : > { %v850_v59 = vsel %vm849_vm8, %v846_v54, %v848_v19  ;;  %v851_v60 = vsel %vm849_vm8, %v848_v19, %v846_v54 }
 0x3e2   : > { %v860_v62 = vmul.f32 %v855_v56, %v850_v59  ;;  %v861_v63 = vmul.f32 %v859_v22, %v851_v60  ;;  %v494_v22 = vld [vmem:[#allocation13] sm:$0xff] }
 0x3e4   : > { %v1933_v5 = vpack.c.bf16 %v860_v62, %v843_v20  ;;  %v865_v6 = vpop.permute.xlu1 %864  ;;  %v1931_v7 = vpack.c.bf16 %v861_v63, %v844_v61 }
 0x3e5   : > { %v868_v31 = vsel %vm866_vm9, %v865_v6, %v863_v3  ;;  %v867_v33 = vsel %vm866_vm9, %v863_v3, %v865_v6 }
 0x3e6   : > { %v878_v11 = vmul.f32 %v1632_v2, %v868_v31  ;;  %1932 = vmatprep.subr.bf16.mxu1 %v1931_v7  ;;  %v877_v12 = vmul.f32 %v1631_v10, %v867_v33 }
 0x3e7   : > { %1934 = vmatpush1.bf16.msra.mxu1 %v1933_v5 }
 0x3e8   : > { %899 = vmatprep.subr.mxu1 %v878_v11 }
 0x3eb   : > { %900 = vmatpush1.msra.mxu1 %v877_v12 }
 0x3ec   : > { %1633 = vmatmul.mubr.msk.f32.vlgmr.msra.gmra.mrb[2].mxu1 %vm879_vm10, %v493_v14  ;;  %1968 = vmatprep.subr.bf16.mxu1 %v2944_v8 }
 0x3ed   : > { %1970 = vmatpush3.bf16.msra.mxu1 %v2946_v9 }
 0x3ee   : > { %1972 = vmatprep.subr.bf16.mxu1 %v2950_v13 }
 0x3f1   : > { %1974 = vmatpush3.bf16.msra.mxu1 %v2957_v17 }
 0x3f2   : > { %1976 = vmatprep.subr.bf16.mxu1 %v2961_v18 }
 0x3f5   : > { %1978 = vmatpush3.bf16.msra.mxu1 %v2966_v23 }
 0x3f6   : > { %1980 = vmatprep.subr.bf16.mxu1 %v2969_v24 }
 0x3f9   : > { %1982 = vmatpush3.bf16.msra.mxu1 %v2974_v29 }
 0x3fa   : > { %1984 = vmatprep.subr.bf16.mxu1 %v2977_v30 }
 0x3fd   : > { %1986 = vmatpush3.bf16.msra.mxu1 %v2982_v35 }
 0x3fe   : > { %1988 = vmatprep.subr.bf16.mxu1 %v2985_v36 }
 0x401   : > { %1990 = vmatpush3.bf16.msra.mxu1 %v2990_v41 }
 0x402   : > { %1992 = vmatprep.subr.bf16.mxu1 %v2993_v42 }
 0x405   : > { %1994 = vmatpush3.bf16.msra.mxu1 %v2998_v47 }
 0x406   : > { %1996 = vmatprep.subr.bf16.mxu1 %v3001_v48 }
 0x409   : > { %1998 = vmatpush3.bf16.msra.mxu1 %v3009_v51 }
 0x40a   : > { %2032 = vmatprep.subr.bf16.mxu1 %v2944_v8 }
 0x4bf   : > { %v949_v27 = vpop.f32.mrb[2].mxu1 }
 0x4c0   : > { %v951_v15 = vpop.f32.mrb[3].mxu1  ;;  %v1024_v21 = vmul.f32 %v949_v27, %v949_v27 }
 0x4c1   : > { %v1025_v16 = vmul.f32 %v951_v15, %v951_v15  ;;  %1018 = vmatprep.mubr.f32.mxu0 %v951_v15 }
 0x4c2   : > { %1019 = vmatmul.mubr.f32.vlgmr.msra.gmra.mrb[4].mxu0 %v949_v27 }
 0x4c3   : > { %1090 = vmatprep.mubr.f32.mxu1 %v1025_v16  ;;  %1186 = vmatprep.mubr.f32.mxu0 %v2564_v0 }
 0x4c4   : > { %1091 = vmatmul.mubr.f32.vlgmr.msra.gmra.mrb[4].mxu1 %v1024_v21 }
 0x4c5   : > { %2034 = vmatpush3.bf16.msra.mxu1 %v2946_v9 }
 0x4c6   : > { %2036 = vmatprep.subr.bf16.mxu1 %v2950_v13 }
 0x4c9   : > { %2038 = vmatpush3.bf16.msra.mxu1 %v2957_v17 }
 0x4ca   : > { %2040 = vmatprep.subr.bf16.mxu1 %v2961_v18 }
 0x4cd   : > { %2042 = vmatpush3.bf16.msra.mxu1 %v2966_v23 }
 0x4ce   : > { %2044 = vmatprep.subr.bf16.mxu1 %v2969_v24 }
 0x4d1   : > { %2046 = vmatpush3.bf16.msra.mxu1 %v2974_v29 }
 0x4d2   : > { %2048 = vmatprep.subr.bf16.mxu1 %v2977_v30 }
 0x4d5   : > { %2050 = vmatpush3.bf16.msra.mxu1 %v2982_v35 }
 0x4d6   : > { %2052 = vmatprep.subr.bf16.mxu1 %v2985_v36 }
 0x4d9   : > { %2054 = vmatpush3.bf16.msra.mxu1 %v2990_v41 }
 0x4da   : > { %2056 = vmatprep.subr.bf16.mxu1 %v2993_v42 }
 0x4dd   : > { %2058 = vmatpush3.bf16.msra.mxu1 %v2998_v47 }
 0x4de   : > { %2060 = vmatprep.subr.bf16.mxu1 %v3001_v48 }
 0x4e1   : > { %2062 = vmatpush3.bf16.msra.mxu1 %v3009_v51 }
 0x595   : > { %v1747_v25 = vpop.f32.mrb[4].mxu0 }
 0x596   : > { %v1748_v26 = vpop.f32.mrb[5].mxu0 }
 0x597   : > { %v1749_v28 = vadd.f32 %v1748_v26, %v1747_v25  ;;  %v1782_v32 = vpop.f32.mrb[4].mxu1 }
 0x598   : > { %v1783_v37 = vpop.f32.mrb[5].mxu1 }
 0x599   : > { %v1096_v38 = vmul.f32 %v1749_v28, %v1749_v28  ;;  %v1784_v39 = vadd.f32 %v1783_v37, %v1782_v32  ;;  %v1100_v43 = vsub.f32 0.0, %v1749_v28 }
 0x59b   : > { %v1097_v40 = vsub.f32 %v1784_v39, %v1096_v38 }
 0x59d   : > { %v1098_v34 = vadd.f32 1e-05, %v1097_v40 }
 0x59f   : > { %2209 = vrsqrt.f32 %v1098_v34 }
 0x5a9   : > { %v2210_v44 = vpop.eup %2209 }
 0x5aa   : > { %1104 = vperm.xlu0 %2204, %v2210_v44   ;;  %v1101_v45 = vmul.f32 %v2210_v44, %v1100_v43 }
 0x5ac   : > { %1111 = vperm.xlu1 %2205, %v1101_v45  }
 0x629   : > { %v1105_v46 = vpop.permute.xlu0 %1104 }
 0x62a   : > { %v1107_v49 = vmul.f32 %v1105_v46, %v949_v27  ;;  %v1108_v50 = vmul.f32 %v1105_v46, %v951_v15 }
 0x62b   : > { %v1112_v52 = vpop.permute.xlu1 %1111 }
 0x62c   : > { %v1114_v53 = vadd.f32 %v1112_v52, %v1107_v49  ;;  %v1115_v54 = vadd.f32 %v1112_v52, %v1108_v50 }
 0x62e   : > { %v1116_v55 = vmax.f32 %v1114_v53, 0.0  ;;  %v1117_v56 = vmax.f32 %v1115_v54, 0.0 }
 0x630   : > { %1122 = vmatprep.subr.mxu0 %v1117_v56 }
 0x631   : > { %1123 = vmatpush1.msra.mxu0 %v1116_v55 }
 0x632   : > { %1634 = vmatmul.mubr.msk.f32.vlgmr.msra.gmra.mrb[6].mxu0 %vm1118_vm11, %v494_v22  ;;  %2000 = vmatprep.subr.bf16.mxu0 %v2944_v8 }
 0x633   : > { %2002 = vmatpush3.bf16.msra.mxu0 %v2946_v9 }
 0x634   : > { %2004 = vmatprep.subr.bf16.mxu0 %v2950_v13 }
 0x637   : > { %2006 = vmatpush3.bf16.msra.mxu0 %v2957_v17 }
 0x638   : > { %2008 = vmatprep.subr.bf16.mxu0 %v2961_v18  ;;  %v1357_v18 = vld [vmem:[#allocation14] sm:$0xff] }
 0x63b   : > { %2010 = vmatpush3.bf16.msra.mxu0 %v2966_v23 }
 0x63c   : > { %2012 = vmatprep.subr.bf16.mxu0 %v2969_v24 }
 0x63f   : > { %2014 = vmatpush3.bf16.msra.mxu0 %v2974_v29 }
 0x640   : > { %2016 = vmatprep.subr.bf16.mxu0 %v2977_v30 }
 0x643   : > { %2018 = vmatpush3.bf16.msra.mxu0 %v2982_v35 }
 0x644   : > { %2020 = vmatprep.subr.bf16.mxu0 %v2985_v36 }
 0x647   : > { %2022 = vmatpush3.bf16.msra.mxu0 %v2990_v41 }
 0x648   : > { %2024 = vmatprep.subr.bf16.mxu0 %v2993_v42 }
 0x64b   : > { %2026 = vmatpush3.bf16.msra.mxu0 %v2998_v47 }
 0x64c   : > { %2028 = vmatprep.subr.bf16.mxu0 %v3001_v48 }
 0x64f   : > { %2030 = vmatpush3.bf16.msra.mxu0 %v3009_v51  ;;  %v1358_v51 = vld [vmem:[#allocation16] sm:$0xff] }
 0x650   : > { %1635 = vmatprep.subr.msk.mxu0 %vm501_vm0, %v2942_v4 }
 0x705   : > { %v1188_v8 = vpop.f32.mrb[6].mxu0 }
 0x706   : > { %v1190_v9 = vpop.f32.mrb[7].mxu0  ;;  %v1263_v17 = vmul.f32 %v1188_v8, %v1188_v8 }
 0x707   : > { %v1264_v13 = vmul.f32 %v1190_v9, %v1190_v9  ;;  %1257 = vmatprep.mubr.f32.mxu0 %v1190_v9 }
 0x708   : > { %1258 = vmatmul.mubr.f32.vlgmr.msra.gmra.mrb[8].mxu0 %v1188_v8 }
 0x709   : > { %1329 = vmatprep.mubr.f32.mxu1 %v1264_v13  ;;  %1636 = vmatpush1.msk.msra.mxu0 %vm501_vm0, %v2938_v1 }
 0x70a   : > { %1330 = vmatmul.mubr.f32.vlgmr.msra.gmra.mrb[6].mxu1 %v1263_v17  ;;  %1431 = vmatprep.mubr.f32.mxu0 %v2564_v0 }
 0x70c   : > { %1637 = vmatmul.mubr.msk.f32.vlgmr.msra.gmra.mrb[10].mxu0 %vm497_vm1, %v1357_v18 }
 0x7db   : > { %v1817_v23 = vpop.f32.mrb[8].mxu0 }
 0x7dc   : > { %v1818_v24 = vpop.f32.mrb[9].mxu0 }
 0x7dd   : > { %v1819_v29 = vadd.f32 %v1818_v24, %v1817_v23  ;;  %v1852_v4 = vpop.f32.mrb[6].mxu1 }
 0x7de   : > { %v1853_v30 = vpop.f32.mrb[7].mxu1 }
 0x7df   : > { %v1335_v35 = vmul.f32 %v1819_v29, %v1819_v29  ;;  %v1854_v36 = vadd.f32 %v1853_v30, %v1852_v4  ;;  %v1339_v47 = vsub.f32 0.0, %v1819_v29  ;;  %v1433_v0 = vpop.f32.mrb[10].mxu0 }
 0x7e0   : > { %v1435_v57 = vpop.f32.mrb[11].mxu0 }
 0x7e1   : > { %v1336_v41 = vsub.f32 %v1854_v36, %v1335_v35 }
 0x7e3   : > { %v1337_v42 = vadd.f32 1e-05, %v1336_v41 }
 0x7e5   : > { %2211 = vrsqrt.f32 %v1337_v42 }
 0x7ef   : > { %v2212_v48 = vpop.eup %2211 }
 0x7f0   : > { %1343 = vperm.xlu0 %2204, %v2212_v48   ;;  %v1340_v1 = vmul.f32 %v2212_v48, %v1339_v47 }
 0x7f2   : > { %1350 = vperm.xlu1 %2205, %v1340_v1  }
 0x7f4   : > { %1361 = vperm.xlu0 %2204, %v1358_v51  }
 0x86f   : > { %v1344_v58 = vpop.permute.xlu0 %1343 }
 0x870   : > { %v1346_v19 = vmul.f32 %v1344_v58, %v1188_v8  ;;  %v1347_v59 = vmul.f32 %v1344_v58, %v1190_v9 }
 0x871   : > { %v1351_v60 = vpop.permute.xlu1 %1350 }
 0x872   : > { %v1353_v20 = vadd.f32 %v1351_v60, %v1346_v19  ;;  %v1354_v61 = vadd.f32 %v1351_v60, %v1347_v59 }
 0x873   : > { %v1362_v62 = vpop.permute.xlu0 %1361 }
 0x874   : > { %v1355_v63 = vmax.f32 %v1353_v20, 0.0  ;;  %v1356_v2 = vmax.f32 %v1354_v61, 0.0  ;;  %v1434_v3 = vadd.f32 %v1433_v0, %v1362_v62  ;;  %v1436_v5 = vadd.f32 %v1435_v57, %v1362_v62 }
 0x876   : > { %v1438_v6 = vadd.f32 %v1434_v3, %v1355_v63  ;;  %v1439_v7 = vadd.f32 %v1436_v5, %v1356_v2 }
 0x878   : > { %1440 = vst [vmem:[%s452_s24] sm:$0xff] %v1438_v6  ;;  %1441 = vst [vmem:[%s452_s24 + $0x8] sm:$0xff] %v1439_v7 }
 0x879   : > { %2480 = shalt.err (!%p2477_p10)
}
 0x87a   : > { %s2481_s23 = scalar_lea.hbm %s3149_s26, 256  ;;  %s2485_s21 = scalar_lea.hbm %s3230_s16, 512 }
 0x87b   : > { %p2482_p11 = scmp.ne.s32.totalorder %s3149_s26, %s2481_s23  ;;  %p2486_p7 = scmp.lt.u32.totalorder %s3149_s26, %s3230_s16 }
 0x87c   : > { %p2487_p6 = scmp.lt.u32.totalorder %s2485_s21, %s2481_s23  ;;  %p2489_p12 = scmp.lt.u32.totalorder %s2481_s23, %s3149_s26 }
 0x87d   : > { %p2483_p8 = pnand %p2482_p11, %p3231_p13 }
 0x87e   : > { %p2488_p9 = por %p2487_p6, %p2486_p7 }
 0x87f   : > { %p2484_p5 = pneg %p2483_p8 }
 0x880   : > { %p2490_p1 = por %p2489_p12, %p2488_p9 }
 0x882   : > { %p2491_p3 = pnand %p2490_p1, %p2484_p5 }
 0x884   : > { %2494 = shalt.err (!%p2491_p3)
}
 0x885   : > { %2097 = dma.vmem_to_hbm [thread:$0]  (%p3231_p13), %s3151_s18, 256, %s3149_s26, %s1443_s15  }
 0x886 PF: > { %s1469_s1 = sand.u32 1, %s2537_s30   ;;  %p3232_p2 = scmp.ne.s32.totalorder %s3219_s9, 0 }
 0x887   : > { %p3233_p0 = scmp.ge.s32.totalorder %s2549_s12, 2  ;;  %s1470_s25 = scalar_lea.sflag [#allocation4], %s1469_s1 }
 0x889   : > { %p2129_p4 = pnand %p3233_p0, %p3232_p2 }
 0x88b   : > { %2532 = dma.done.wait (!%p2129_p4), %s1470_s25, 256  }
 0x88c   : > { %2534 = vsyncadd (!%p2129_p4), %s1470_s25, 4294967040  ;;  %p26_p10 = scmp.ge.s32.totalorder %s2837_s19, 4   ;;  %s3234_s30 = smov %s2541_s10 }
 0x88d   : > { %s3235_s10 = smov %s2545_s11  ;;  %s3236_s11 = smov %s2848_s14 }
 0x88e   : > { %s3237_s12 = smov %s2837_s19  ;;  %28 = sbr.rel (!%p26_p10) target bundleno = 13 (0xd), region = 133 }
 0x895   :  { %1475 = vsyncpa [#allocation3], 1 }
 0x896   :  { %1477 = vsyncpa [#allocation3 + $0x1], 1 }
 0x897   :  { %1478 = vsyncpa [#allocation6], 1 }
 0x898   :  { %1479 = vsyncpa [#allocation9], 1 }
 0x899   :  { %1480 = vsyncpa [#allocation12], 1 }
 0x89a   :  { %1481 = vsyncpa [#allocation15], 1 }
 0x89b   :  { %1482 = vsyncpa [#allocation4], 1 }
 0x89c   :  { %1484 = vsyncpa [#allocation4 + $0x1], 1 }

</bundles_post_ra>
